<compile_context>
chip_gen: v7x
topology: tpu7x:2x2x1
jax: 0.10.0
libtpu: 0.0.40
codegen_flags: <defaults>
</compile_context>

<pallas_src>
import math
from functools import partial

import jax
import jax.numpy as jnp
from jax.experimental import pallas as pl
from jax.experimental.pallas import tpu as pltpu


def _round_up(x: int, m: int) -> int:
    return ((x + m - 1) // m) * m


def _balanced_tile(dim: int, cap: int, align: int):
    """Even split of the aligned dim into tiles <= ~cap; returns (tile, padded_dim)."""
    dp = _round_up(dim, align)
    n = -(-dp // cap)                       # number of tiles
    t = _round_up(-(-dp // n), align)       # even tile size, aligned
    return t, t * n


def _vmem_budget_bytes() -> int:
    """Per-generation scoped-VMEM budget with headroom (v7x has only 64 MiB)."""
    try:
        phys = pltpu.get_tpu_info().vmem_capacity_bytes
    except Exception:
        phys = 64 * 1024 * 1024             # conservative fallback (v7x-sized)
    return min((phys * 3) // 4, 96 * 1024 * 1024)


# ----------------------------------------------------------------------------
# Kernels
# ----------------------------------------------------------------------------
def _mlp_kernel_single_k(compute_dtype, x_ref, w_ref, b_ref, o_ref):
    # x_ref: (tm, Kp)   x dtype (cast to compute_dtype on the VPU if needed)
    # w_ref: (Kp, tn)   compute_dtype, pre-transposed -> canonical contraction
    # b_ref: (1,  tn)   float32
    # o_ref: (tm, tn)
    acc = jnp.dot(
        x_ref[...].astype(compute_dtype),
        w_ref[...],
        preferred_element_type=jnp.float32,
    )
    o_ref[...] = jnp.maximum(acc + b_ref[...], 0.0).astype(o_ref.dtype)


def _mlp_kernel_multi_k(compute_dtype, x_ref, w_ref, b_ref, o_ref, acc_ref):
    # Same as above, but K spans several grid steps: f32 VMEM accumulator,
    # zeroed at k == 0, bias + ReLU epilogue only on the last k step.
    k = pl.program_id(2)

    @pl.when(k == 0)
    def _():
        acc_ref[...] = jnp.zeros_like(acc_ref)

    acc_ref[...] += jnp.dot(
        x_ref[...].astype(compute_dtype),
        w_ref[...],
        preferred_element_type=jnp.float32,
    )

    @pl.when(k == pl.num_programs(2) - 1)
    def _():
        o_ref[...] = jnp.maximum(acc_ref[...] + b_ref[...], 0.0).astype(o_ref.dtype)


# ----------------------------------------------------------------------------
# One-time parameter formatting (do this at init, NOT per forward call)
# ----------------------------------------------------------------------------
def make_mlp_params(
    weight,                      # (N, K) float32, PyTorch nn.Linear layout
    bias,                        # (N,)   float32
    *,
    compute_dtype=jnp.bfloat16,  # MXU input dtype (f32 accumulation always)
    tn_max=512,
    tk_max=1024,
    tm_hint=512,                 # used only for the VMEM-fit estimate
    force_tiled=False,
):
    N, K = weight.shape
    assert bias.shape == (N,)
    wbytes = jnp.dtype(compute_dtype).itemsize
    budget = _vmem_budget_bytes()

    Kp128 = _round_up(K, 128)
    Np128 = _round_up(N, 128)

    # Weight-resident if the whole panel + streamed x / out tiles fit the
    # per-generation budget (conservatively counts double-buffering).
    resident_bytes = (
        2 * Kp128 * Np128 * wbytes      # weight panel (double-buffer worst case)
        + 2 * tm_hint * Kp128 * 4       # x tiles (f32 worst case)
        + 2 * tm_hint * Np128 * 4       # output tiles (f32 worst case)
        + 2 * Np128 * 4                 # bias
    )
    weight_resident = (not force_tiled) and (resident_bytes <= budget)

    if weight_resident:
        tk, Kp = Kp128, Kp128
        tn, Np = Np128, Np128
    else:
        tk, Kp = _balanced_tile(K, tk_max, 128)
        tn, Np = _balanced_tile(N, tn_max, 128)

    # One-time HBM-side formatting: transpose to (K, N) (canonical contraction
    # in-kernel, no XLU transpose), cast, pad. Happens once at init.
    wt = weight.T.astype(compute_dtype)
    if (Kp, Np) != (K, N):
        wt = jnp.pad(wt, ((0, Kp - K), (0, Np - N)))
    b2d = bias.astype(jnp.float32).reshape(1, N)
    if Np != N:
        b2d = jnp.pad(b2d, ((0, 0), (0, Np - N)))

    return dict(
        wt=wt, b2d=b2d, N=N, K=K, Kp=Kp, Np=Np, tk=tk, tn=tn,
        compute_dtype=compute_dtype, vmem_budget=budget,
        weight_resident=weight_resident,
    )


# ----------------------------------------------------------------------------
# Forward
# ----------------------------------------------------------------------------
def mlp_forward(x, params, *, tm_max=512, out_dtype=None):
    """relu(x @ weight.T + bias) with pre-formatted params from make_mlp_params."""
    M, K = x.shape
    assert K == params["K"], (K, params["K"])
    compute_dtype = params["compute_dtype"]
    Kp, Np, tk, tn = params["Kp"], params["Np"], params["tk"], params["tn"]
    N = params["N"]
    out_dtype = x.dtype if out_dtype is None else out_dtype

    tm, Mp = _balanced_tile(M, tm_max, 16)

    # x cast: wrapper-side single pass only when each x tile is re-read across
    # >= 2 N tiles; otherwise DMA x as-is and cast on the VPU in-kernel.
    x_reuse = Np // tn
    xc = x
    if x_reuse >= 2 and jnp.dtype(compute_dtype) != jnp.dtype(x.dtype):
        xc = x.astype(compute_dtype)
    if (Mp, Kp) != (M, K):
        xc = jnp.pad(xc, ((0, Mp - M), (0, Kp - K)))

    wt, b2d = params["wt"], params["b2d"]
    nk = Kp // tk
    vmem_limit = int(params["vmem_budget"])

    if nk == 1:
        # Single-k fast path: no accumulator scratch, no pl.when, 2-D grid.
        grid = (Mp // tm, Np // tn)
        out = pl.pallas_call(
            partial(_mlp_kernel_single_k, compute_dtype),
            out_shape=jax.ShapeDtypeStruct((Mp, Np), out_dtype),
            grid_spec=pltpu.PrefetchScalarGridSpec(
                num_scalar_prefetch=0,
                grid=grid,
                in_specs=[
                    pl.BlockSpec((tm, Kp), lambda i, j: (i, 0)),   # x
                    pl.BlockSpec((Kp, tn), lambda i, j: (0, j)),   # weight (K, N)
                    pl.BlockSpec((1, tn), lambda i, j: (0, j)),    # bias
                ],
                out_specs=pl.BlockSpec((tm, tn), lambda i, j: (i, j)),
            ),
            compiler_params=pltpu.CompilerParams(
                dimension_semantics=("parallel", "parallel"),
                vmem_limit_bytes=vmem_limit,
            ),
        )(xc, wt, b2d)
    else:
        # K spans multiple tiles: 3-D grid, f32 VMEM accumulator, K last.
        grid = (Mp // tm, Np // tn, nk)
        out = pl.pallas_call(
            partial(_mlp_kernel_multi_k, compute_dtype),
            out_shape=jax.ShapeDtypeStruct((Mp, Np), out_dtype),
            grid_spec=pltpu.PrefetchScalarGridSpec(
                num_scalar_prefetch=0,
                grid=grid,
                in_specs=[
                    pl.BlockSpec((tm, tk), lambda i, j, k: (i, k)),   # x
                    pl.BlockSpec((tk, tn), lambda i, j, k: (k, j)),   # weight (K, N)
                    pl.BlockSpec((1, tn), lambda i, j, k: (0, j)),    # bias
                ],
                out_specs=pl.BlockSpec((tm, tn), lambda i, j, k: (i, j)),
                scratch_shapes=[pltpu.VMEM((tm, tn), jnp.float32)],
            ),
            compiler_params=pltpu.CompilerParams(
                dimension_semantics=("parallel", "parallel", "arbitrary"),
                vmem_limit_bytes=vmem_limit,
            ),
        )(xc, wt, b2d)

    if (Mp, Np) != (M, N):
        out = out[:M, :N]
    return out


def init_params(key, in_channels, out_channels):
    """Deterministic init mimicking nn.Linear default (Kaiming-uniform-ish)."""
    kw, kb = jax.random.split(key)
    bound = 1.0 / math.sqrt(in_channels)
    weight = jax.random.uniform(
        kw, (out_channels, in_channels), jnp.float32, -bound, bound
    )
    bias = jax.random.uniform(kb, (out_channels,), jnp.float32, -bound, bound)
    return weight, bias


# TODO(synk): torch.utils.checkpoint + dummy_tensor only affect autograd
# recomputation; the forward pass is identical to features(x), so nothing
# else to translate.

if __name__ == "__main__":
    key = jax.random.PRNGKey(0)
    kx, kp, kx2, kp2 = jax.random.split(key, 4)

    batch = 8
    in_channels = 32
    out_channels = 64

    x = jax.random.normal(kx, (batch, in_channels), jnp.float32)
    weight, bias = init_params(kp, in_channels, out_channels)
    ref = jnp.maximum(x @ weight.T + bias, 0.0)

    # Exact f32 path (tight correctness check) -- weight-resident, single-k.
    params_f32 = make_mlp_params(weight, bias, compute_dtype=jnp.float32)
    out_f32 = jax.block_until_ready(mlp_forward(x, params_f32))

    # Default bf16-MXU / f32-accumulate path (the fast one at real sizes).
    params_bf16 = make_mlp_params(weight, bias)
    out_bf16 = jax.block_until_ready(mlp_forward(x, params_bf16))

    # Reduced-precision output (halves writeback DMA when the consumer allows).
    out_bf16_lo = jax.block_until_ready(
        mlp_forward(x, params_bf16, out_dtype=jnp.bfloat16)
    )

    assert out_f32.shape == (batch, out_channels)
    assert out_bf16.shape == (batch, out_channels)
    assert jnp.allclose(out_f32, ref, atol=1e-5, rtol=1e-5)
    assert jnp.allclose(out_bf16, ref, atol=5e-2, rtol=5e-2)
    assert out_bf16_lo.dtype == jnp.bfloat16
    assert jnp.allclose(out_bf16_lo.astype(jnp.float32), ref, atol=1e-1, rtol=1e-1)

    # Also exercise the multi-k (accumulator) path with K spanning two tiles.
    in2 = 256
    x2 = jax.random.normal(kx2, (batch, in2), jnp.float32)
    w2, b2 = init_params(kp2, in2, out_channels)
    params2 = make_mlp_params(w2, b2, tk_max=128, tn_max=128, force_tiled=True)
    out2 = jax.block_until_ready(mlp_forward(x2, params2))
    ref2 = jnp.maximum(x2 @ w2.T + b2, 0.0)
    assert params2["Kp"] // params2["tk"] == 2  # multi-k kernel really ran
    assert jnp.allclose(out2, ref2, atol=5e-2, rtol=5e-2)

    print("KERNEL_OK")
</pallas_src>

<mosaic_0001>
module attributes {stable_mosaic.version = 11 : i64} {
  func.func @_mlp_kernel_single_k(%arg0: i32, %arg1: i32, %arg2: memref<16x128xf32, #tpu.memory_space<vmem>>, %arg3: memref<128x128xf32, #tpu.memory_space<vmem>>, %arg4: memref<1x128xf32, #tpu.memory_space<vmem>>, %arg5: memref<16x128xf32, #tpu.memory_space<vmem>>) attributes {dimension_semantics = [#tpu.dimension_semantics<parallel>, #tpu.dimension_semantics<parallel>], iteration_bounds = array<i64: 1, 1>, scalar_prefetch = 0 : i64, scratch_operands = 0 : i64, tpu.core_type = #tpu.core_type<tc>, window_params = [{transform_indices = @transform_0, window_bounds = array<i64: 16, 128>}, {transform_indices = @transform_1, window_bounds = array<i64: 128, 128>}, {transform_indices = @transform_2, window_bounds = array<i64: 1, 128>}, {transform_indices = @transform_3, window_bounds = array<i64: 16, 128>}]} {
    %c0 = arith.constant 0 : index
    %c0_0 = arith.constant 0 : index
    %0 = vector.load %arg2[%c0, %c0_0] : memref<16x128xf32, #tpu.memory_space<vmem>>, vector<16x128xf32>
    %c0_1 = arith.constant 0 : index
    %c0_2 = arith.constant 0 : index
    %1 = vector.load %arg3[%c0_1, %c0_2] : memref<128x128xf32, #tpu.memory_space<vmem>>, vector<128x128xf32>
    %cst = arith.constant dense<0.000000e+00> : vector<16x128xf32>
    %2 = tpu.matmul %0, %1, %cst {dimension_numbers = #tpu.dot_dimension_numbers<[1], [0], [0], [1], [0, 0, 1, 1], [], []>} : vector<16x128xf32>, vector<128x128xf32>, vector<16x128xf32> -> vector<16x128xf32>
    %c0_3 = arith.constant 0 : index
    %c0_4 = arith.constant 0 : index
    %3 = vector.load %arg4[%c0_3, %c0_4] : memref<1x128xf32, #tpu.memory_space<vmem>>, vector<1x128xf32>
    %4 = vector.broadcast %3 : vector<1x128xf32> to vector<16x128xf32>
    %5 = arith.addf %2, %4 : vector<16x128xf32>
    %cst_5 = arith.constant 0.000000e+00 : f32
    %6 = vector.broadcast %cst_5 : f32 to vector<16x128xf32>
    %7 = arith.maximumf %5, %6 : vector<16x128xf32>
    %c0_6 = arith.constant 0 : index
    %c0_7 = arith.constant 0 : index
    %8 = vector.load %arg5[%c0_6, %c0_7] : memref<16x128xf32, #tpu.memory_space<vmem>>, vector<16x128xf32>
    tpu.vector_store %arg5[%c0_6, %c0_7], %7 {strides = array<i32>} : memref<16x128xf32, #tpu.memory_space<vmem>>, vector<16x128xf32>,
    return
  }
  func.func @transform_0(%arg0: i32, %arg1: i32) -> (i32, i32) {
    %c0_i32 = arith.constant 0 : i32
    %c0_i32_0 = arith.constant 0 : i32
    return %arg0, %c0_i32 : i32, i32
  }
  func.func @transform_1(%arg0: i32, %arg1: i32) -> (i32, i32) {
    %c0_i32 = arith.constant 0 : i32
    %c0_i32_0 = arith.constant 0 : i32
    return %c0_i32, %arg1 : i32, i32
  }
  func.func @transform_2(%arg0: i32, %arg1: i32) -> (i32, i32) {
    %c0_i32 = arith.constant 0 : i32
    %c0_i32_0 = arith.constant 0 : i32
    return %c0_i32, %arg1 : i32, i32
  }
  func.func @transform_3(%arg0: i32, %arg1: i32) -> (i32, i32) {
    %c0_i32 = arith.constant 0 : i32
    return %arg0, %arg1 : i32, i32
  }
}

</mosaic_0001>

<bundles_post_ra>
// kernel: tpu_custom_call.1
= control target key start
LH: loop header
LB: loop body
LE: loop exit
PB: predicated region body
PF: predicated region fallthrough
CT: control target
= control target key end

     0   :  { %8 = vsyncpa [#allocation3], 0  ;;  %s401_s0 = inlined_call_operand.hbm [shape: f32[16,128], index: 0, kind: input, shape index: {}]   ;;  %s402_s1 = inlined_call_operand.hbm [shape: f32[128,128], index: 1, kind: input, shape index: {}]   ;;  %s403_s2 = inlined_call_operand.vmem [shape: f32[1,128], index: 2, kind: input, shape index: {}]   ;;  %s404_s3 = inlined_call_operand.hbm [shape: f32[16,128], index: 3, kind: output, shape index: {}]  }
   0x1   :  { %9 = vsyncpa [#allocation6], 0 }
   0x2   :  { %10 = vsyncpa [#allocation4], 0  ;;  %s328_s12 = smov [#allocation2]   ;;  %s256_s16 = scalar_lea.hbm %s401_s0, 256 }
   0x3   :  { %s16_s13 = sshll.u32 %s328_s12, 4  ;;  %p257_p0 = scmp.ne.s32.totalorder %s401_s0, %s256_s16  ;;  %s17_s13 = int_to_ptr.vmem [resolvable:$true] %s16_s13 }
   0x4   :  { %p260_p1 = scmp.lt.u32.totalorder %s256_s16, %s401_s0 }
   0x6   :  { %p262_p2 = pnand %p260_p1, %p257_p0 }
   0x8   :  { %265 = shalt.err (!%p262_p2)
}
   0x9   :  { %s266_s21 = scalar_lea.vmem %s17_s13, 256  ;;  %p271_p4 = scmp.lt.s32.totalorder %s17_s13, %s17_s13 }
   0xa   :  { %p267_p3 = scmp.ne.s32.totalorder %s17_s13, %s266_s21  ;;  %p272_p5 = scmp.lt.s32.totalorder %s266_s21, %s266_s21 }
   0xc   :  { %p273_p6 = por %p272_p5, %p271_p4 }
   0xe   :  { %p274_p7 = pnand %p273_p6, %p267_p3 }
  0x10   :  { %277 = shalt.err (!%p274_p7)
}
  0x11   :  { %s329_s22 = smov 128   ;;  %s330_s23 = smov 8  }
  0x12   :  { %22 = dma.hbm_to_vmem [thread:$0]  %s401_s0, 256, %s17_s13, [#allocation3], %s329_s22, %s329_s22, %s330_s23  }
  0x13   :  { %s331_s26 = smov [#allocation5]   ;;  %s278_s30 = scalar_lea.hbm %s402_s1, 2048 }
  0x14   :  { %s28_s27 = sshll.u32 %s331_s26, 4  ;;  %p279_p8 = scmp.ne.s32.totalorder %s402_s1, %s278_s30  ;;  %s29_s27 = int_to_ptr.vmem [resolvable:$true] %s28_s27 }
  0x15   :  { %p282_p9 = scmp.lt.u32.totalorder %s278_s30, %s402_s1 }
  0x17   :  { %p284_p10 = pnand %p282_p9, %p279_p8 }
  0x19   :  { %287 = shalt.err (!%p284_p10)
}
  0x1a   :  { %s288_s8 = scalar_lea.vmem %s29_s27, 2048  ;;  %p293_p12 = scmp.lt.s32.totalorder %s29_s27, %s29_s27 }
  0x1b   :  { %p289_p11 = scmp.ne.s32.totalorder %s29_s27, %s288_s8  ;;  %p294_p13 = scmp.lt.s32.totalorder %s288_s8, %s288_s8 }
  0x1d   :  { %p295_p0 = por %p294_p13, %p293_p12 }
  0x1f   :  { %p296_p1 = pnand %p295_p0, %p289_p11 }
  0x21   :  { %299 = shalt.err (!%p296_p1)
}
  0x22   :  { %34 = dma.hbm_to_vmem [thread:$0]  %s402_s1, 2048, %s29_s27, [#allocation6], %s329_s22, %s329_s22, %s330_s23  }
  0x23   :  { %322 = dma.done.wait [#allocation3], 256  }
  0x24   :  { %323 = vsyncadd [#allocation3], 4294967040 }
  0x25   :  { %324 = dma.done.wait [#allocation6], 2048  }
  0x26   :  { %325 = vsyncadd [#allocation6], 4294965248  ;;  %v45_v0 = vld [vmem:[#allocation5] sm:$0xff]  ;;  %v46_v1 = vld [vmem:[#allocation5 + $0x8] sm:$0xff]  ;;  %s332_s11 = smov [#allocation7]  }
  0x27   :  { %v47_v2 = vld [vmem:[#allocation5 + $0x10] sm:$0xff]  ;;  %v219_v3 = vpack.c.bf16 %v46_v1, %v45_v0  ;;  %v48_v4 = vld [vmem:[#allocation5 + $0x18] sm:$0xff]  ;;  %v49_v6 = vld [vmem:[#allocation5 + $0x20] sm:$0xff]  ;;  %s152_s12 = sshll.u32 %s332_s11, 4  ;;  %s153_s12 = int_to_ptr.vmem [resolvable:$true] %s152_s12 }
  0x28   :  { %v223_v5 = vpack.c.bf16 %v48_v4, %v47_v2  ;;  %v50_v7 = vld [vmem:[#allocation5 + $0x28] sm:$0xff]  ;;  %v43_v9 = vld [vmem:[#allocation2] sm:$0xff]  ;;  %v52_v11 = vld [vmem:[#allocation5 + $0x38] sm:$0xff]  ;;  %s300_s13 = scalar_lea.vmem %s153_s12, 256  ;;  %p305_p3 = scmp.lt.s32.totalorder %s153_s12, %s153_s12 }
  0x29   :  { %220 = vmatprep.subr.bf16.mxu0 %v219_v3  ;;  %v227_v8 = vpack.c.bf16 %v50_v7, %v49_v6  ;;  %v51_v10 = vld [vmem:[#allocation5 + $0x30] sm:$0xff]  ;;  %216 = vmatprep.mubr.f32.mxu0 %v43_v9  ;;  %v53_v13 = vld [vmem:[#allocation5 + $0x40] sm:$0xff]  ;;  %v54_v14 = vld [vmem:[#allocation5 + $0x48] sm:$0xff]  ;;  %p301_p2 = scmp.ne.s32.totalorder %s153_s12, %s300_s13  ;;  %p306_p4 = scmp.lt.s32.totalorder %s300_s13, %s300_s13 }
  0x2a   :  { %222 = vmatpush3.bf16.msra.mxu0 %v219_v3  ;;  %v231_v12 = vpack.c.bf16 %v52_v11, %v51_v10  ;;  %v235_v15 = vpack.c.bf16 %v54_v14, %v53_v13  ;;  %v55_v16 = vld [vmem:[#allocation5 + $0x50] sm:$0xff]  ;;  %v56_v17 = vld [vmem:[#allocation5 + $0x58] sm:$0xff]  ;;  %v57_v19 = vld [vmem:[#allocation5 + $0x60] sm:$0xff] }
  0x2b   :  { %224 = vmatprep.subr.bf16.mxu0 %v223_v5  ;;  %v239_v18 = vpack.c.bf16 %v56_v17, %v55_v16  ;;  %v58_v20 = vld [vmem:[#allocation5 + $0x68] sm:$0xff]  ;;  %v59_v22 = vld [vmem:[#allocation5 + $0x70] sm:$0xff]  ;;  %v60_v23 = vld [vmem:[#allocation5 + $0x78] sm:$0xff]  ;;  %p307_p5 = por %p306_p4, %p305_p3 }
  0x2c   :  { %v243_v21 = vpack.c.bf16 %v58_v20, %v57_v19  ;;  %v247_v24 = vpack.c.bf16 %v60_v23, %v59_v22  ;;  %v44_v25 = vld [vmem:[#allocation2 + $0x8] sm:$0xff]  ;;  %v165_v26 = vld [vmem:[%s403_s2] ss:$0 sm:$0xff] }
  0x2d   :  { %p308_p6 = pnand %p307_p5, %p301_p2 }
  0x2e   :  { %226 = vmatpush3.bf16.msra.mxu0 %v223_v5 }
  0x2f   :  { %228 = vmatprep.subr.bf16.mxu0 %v227_v8 }
  0x32   :  { %230 = vmatpush3.bf16.msra.mxu0 %v227_v8 }
  0x33   :  { %232 = vmatprep.subr.bf16.mxu0 %v231_v12 }
  0x36   :  { %234 = vmatpush3.bf16.msra.mxu0 %v231_v12 }
  0x37   :  { %236 = vmatprep.subr.bf16.mxu0 %v235_v15 }
  0x3a   :  { %238 = vmatpush3.bf16.msra.mxu0 %v235_v15 }
  0x3b   :  { %240 = vmatprep.subr.bf16.mxu0 %v239_v18 }
  0x3e   :  { %242 = vmatpush3.bf16.msra.mxu0 %v239_v18 }
  0x3f   :  { %244 = vmatprep.subr.bf16.mxu0 %v243_v21 }
  0x42   :  { %246 = vmatpush3.bf16.msra.mxu0 %v243_v21 }
  0x43   :  { %248 = vmatprep.subr.bf16.mxu0 %v247_v24 }
  0x46   :  { %250 = vmatpush3.bf16.msra.mxu0 %v247_v24 }
  0x49   :  { %217 = vmatmul.mubr.f32.vlgmr.msra.gmra.mrb[0].mxu0 %v44_v25 }
 0x11c   :  { %v218_v27 = vpop.f32.mrb[0].mxu0 }
 0x11d   :  { %v140_v28 = vadd.f32 %v218_v27, %v165_v26  ;;  %v134_v29 = vpop.f32.mrb[1].mxu0 }
 0x11e   :  { %v135_v30 = vadd.f32 %v165_v26, %v134_v29 }
 0x11f   :  { %v144_v31 = vmax.f32 %v140_v28, 0.0 }
 0x120   :  { %v143_v32 = vmax.f32 %v135_v30, 0.0 }
 0x121   :  { %146 = vst [vmem:[#allocation7 + $0x8] sm:$0xff] %v144_v31 }
 0x122   :  { %145 = vst [vmem:[#allocation7] sm:$0xff] %v143_v32 }
 0x123   :  { %311 = shalt.err (!%p308_p6)
}
 0x124   :  { %s312_s15 = scalar_lea.hbm %s404_s3, 256 }
 0x125   :  { %p313_p7 = scmp.ne.s32.totalorder %s404_s3, %s312_s15  ;;  %p316_p8 = scmp.lt.u32.totalorder %s312_s15, %s404_s3 }
 0x127   :  { %p318_p9 = pnand %p316_p8, %p313_p7 }
 0x129   :  { %321 = shalt.err (!%p318_p9)
}
 0x12a   :  { %158 = dma.vmem_to_hbm [thread:$0]  %s153_s12, 256, %s404_s3, [#allocation4], %s329_s22, %s329_s22, %s330_s23  }
 0x12b   :  { %326 = dma.done.wait [#allocation4], 256  }
 0x12c   :  { %327 = vsyncadd [#allocation4], 4294967040 }
 0x12d   :  { %162 = vsyncpa [#allocation3], 1 }
 0x12e   :  { %163 = vsyncpa [#allocation6], 1 }
 0x12f   :  { %164 = vsyncpa [#allocation4], 1 }

</bundles_post_ra>
